<compile_context>
chip_gen: v7x
topology: tpu7x:2x2x1
jax: 0.10.0
libtpu: 0.0.40
codegen_flags: <defaults>
</compile_context>

<pallas_src>
import functools

import jax
import jax.numpy as jnp
from jax.experimental import pallas as pl
from jax.experimental.pallas import tpu as pltpu


_MiB = 1024 * 1024


def _round_up(a, m):
    return ((a + m - 1) // m) * m


def _cdiv(a, b):
    return (a + b - 1) // b


def _tpu_hw_params():
    """Best-effort (physical VMEM bytes, TensorCores per device)."""
    vmem_phys = 64 * _MiB              # conservative default (v7x per-core VMEM)
    try:
        info = pltpu.get_tpu_info()
        v = getattr(info, "vmem_capacity_bytes", None)
        if v:
            vmem_phys = int(v)
    except Exception:
        pass
    cores = 1
    try:
        kind = jax.devices()[0].device_kind.lower()
        # Dual-TensorCore-per-device parts (megacore v4/v5p, v7x).
        if any(tag in kind for tag in ("v4", "v5p", "v7")):
            cores = 2
    except Exception:
        pass
    return vmem_phys, cores


def _se_fused_kernel(x_ref, w1_ref, w2_ref, o_ref, *, inv_hw):
    """One batch element per grid step: pool -> excite -> scale (fused)."""
    xs = x_ref[0]                                           # (C, HW), native dtype
    # Squeeze: spatial sum on the MXU (no f32 copy of the big tile), then mean.
    ones = jnp.ones((xs.shape[1], 1), dtype=xs.dtype)
    y = jnp.dot(xs, ones, preferred_element_type=jnp.float32) * inv_hw   # (C, 1) f32
    # Excitation: two bias-free linears; only the tiny weight matrices are cast.
    h = jnp.maximum(
        jnp.dot(w1_ref[...].astype(jnp.float32), y,
                preferred_element_type=jnp.float32), 0.0)                # (C_r, 1)
    s = jax.nn.sigmoid(
        jnp.dot(w2_ref[...].astype(jnp.float32), h,
                preferred_element_type=jnp.float32))                     # (C, 1)
    # Scale: multiply in the input dtype (no second upcast of the big tile).
    o_ref[0] = xs * s.astype(xs.dtype)


def _se_scale_kernel(s_ref, x_ref, o_ref):
    """Streaming scale pass: (C, tHW) tile times per-channel gate (C, 1)."""
    o_ref[0] = x_ref[0] * s_ref[0]


def se_layer(x_nchw, w1, w2, *, force_split=False, tile_hw=None, donate_x=False):
    """SELayer forward.  x: (B, C, H, W); w1: (C//r, C); w2: (C, C//r)."""
    B, C, H, W = x_nchw.shape
    C_r = w1.shape[0]
    HW = H * W
    dsize = jnp.dtype(x_nchw.dtype).itemsize

    # Generation-aware VMEM budgets.
    vmem_phys, n_cores = _tpu_hw_params()
    vmem_limit = max(min(vmem_phys - 12 * _MiB, 110 * _MiB), 32 * _MiB)
    fused_budget = max(min(vmem_limit - 8 * _MiB, 96 * _MiB), 24 * _MiB)

    # Honest fused-path VMEM need: in + out slabs (double-buffered), weights
    # (double-buffered), the in-kernel ones vector, plus slack.  The MXU-based
    # pooling avoids any full-size f32 temporary of the slab.
    wbytes = (w1.size * jnp.dtype(w1.dtype).itemsize
              + w2.size * jnp.dtype(w2.dtype).itemsize)
    slab = C * HW * dsize
    fused_need = 4 * slab + 2 * wbytes + HW * dsize + _MiB

    use_fused = (not force_split) and fused_need <= fused_budget
    if use_fused and B == 1 and n_cores >= 2 and HW >= 256:
        # With a single batch element a per-batch grid can only feed one
        # TensorCore; on dual-core parts take the HW-tiled split so both work.
        # (On single-core v5e/v6e we always stay fused for B == 1.)
        use_fused = False

    x2 = x_nchw.reshape(B, C, HW)      # free reshape of contiguous dims

    if use_fused:
        out = pl.pallas_call(
            functools.partial(_se_fused_kernel, inv_hw=1.0 / float(HW)),
            out_shape=jax.ShapeDtypeStruct((B, C, HW), x_nchw.dtype),
            grid_spec=pltpu.PrefetchScalarGridSpec(
                num_scalar_prefetch=0,
                grid=(B,),
                in_specs=[
                    pl.BlockSpec((1, C, HW), lambda b: (b, 0, 0)),
                    pl.BlockSpec((C_r, C), lambda b: (0, 0)),
                    pl.BlockSpec((C, C_r), lambda b: (0, 0)),
                ],
                out_specs=pl.BlockSpec((1, C, HW), lambda b: (b, 0, 0)),
            ),
            compiler_params=pltpu.CompilerParams(
                dimension_semantics=("parallel",),
                vmem_limit_bytes=int(vmem_limit)),
            input_output_aliases=({0: 0} if donate_x else {}),
        )(x2, w1, w2)
    else:
        # Hoisted excitation: one batched, lane-dense matmul for all batches
        # (negligible FLOPs; done in XLA to avoid N=1 matvecs inside the grid).
        y = jnp.mean(x_nchw.astype(jnp.float32), axis=(2, 3))            # (B, C)
        h = jnp.maximum(y @ w1.astype(jnp.float32).T, 0.0)               # (B, C_r)
        s = jax.nn.sigmoid(h @ w2.astype(jnp.float32).T).astype(x_nchw.dtype)
        s3 = s[:, :, None]                                               # (B, C, 1)

        # Tile the true extent (no rounding HW up to the tile size); the last
        # tile may be ragged (Pallas masks the boundary block).
        HW128 = _round_up(HW, 128)
        if tile_hw is not None:
            tHW = _round_up(max(int(tile_hw), 128), 128)
        else:
            per_lane = 4 * C * dsize      # in + out, double-buffered, per lane
            tHW = max((int(fused_budget) // max(per_lane, 1)) // 128 * 128, 128)
            n = max(_cdiv(HW128, tHW), 1)
            if B < n_cores:
                n = max(n, n_cores)       # enough tiles to feed all cores
            tHW = _round_up(_cdiv(HW128, n), 128)
        if tHW >= HW:
            tHW = HW                      # full-extent block (exempt from 128 rule)
        n_hw = _cdiv(HW, tHW)

        out = pl.pallas_call(
            _se_scale_kernel,
            out_shape=jax.ShapeDtypeStruct((B, C, HW), x_nchw.dtype),
            grid_spec=pltpu.PrefetchScalarGridSpec(
                num_scalar_prefetch=0,
                grid=(B, n_hw),
                in_specs=[
                    pl.BlockSpec((1, C, 1), lambda b, t: (b, 0, 0)),
                    pl.BlockSpec((1, C, tHW), lambda b, t: (b, 0, t)),
                ],
                out_specs=pl.BlockSpec((1, C, tHW), lambda b, t: (b, 0, t)),
            ),
            compiler_params=pltpu.CompilerParams(
                dimension_semantics=("parallel", "parallel"),
                vmem_limit_bytes=int(vmem_limit)),
            input_output_aliases=({1: 0} if donate_x else {}),
        )(s3, x2)

    return out.reshape(B, C, H, W)


def se_layer_ref(x, w1, w2):
    # Pure-JAX reference for verification.
    y = jnp.mean(x, axis=(2, 3))                     # (B, C)
    h = jnp.maximum(y @ w1.T, 0.0)                   # (B, C//r)
    s = jax.nn.sigmoid(h @ w2.T)                     # (B, C)
    return x * s[:, :, None, None]


if __name__ == "__main__":
    # Small shapes consistent with the module: batch=2, channels=4, 16x16 spatial.
    B, C, H, W = 2, 4, 16, 16
    reduction = 1
    C_r = C // reduction

    key = jax.random.PRNGKey(0)
    kx, k1, k2, kx2 = jax.random.split(key, 4)

    x = jax.random.normal(kx, (B, C, H, W), dtype=jnp.float32)

    # Deterministic weight init (Kaiming-uniform-like bounds, as in nn.Linear).
    bound1 = 1.0 / (C ** 0.5)
    bound2 = 1.0 / (C_r ** 0.5)
    w1 = jax.random.uniform(k1, (C_r, C), minval=-bound1, maxval=bound1,
                            dtype=jnp.float32)       # Linear(C, C//r)
    w2 = jax.random.uniform(k2, (C, C_r), minval=-bound2, maxval=bound2,
                            dtype=jnp.float32)       # Linear(C//r, C)

    ref = se_layer_ref(x, w1, w2)

    # Default (fused per-batch) path, 128-multiple HW.
    out_fused = jax.block_until_ready(se_layer(x, w1, w2))
    assert out_fused.shape == (B, C, H, W)
    assert jnp.allclose(out_fused, ref, atol=2e-5, rtol=1e-5), "fused mismatch"

    # Fused path with a non-128-multiple spatial extent (no padding anywhere).
    x_odd = jax.random.normal(kx2, (B, C, 15, 15), dtype=jnp.float32)
    ref_odd = se_layer_ref(x_odd, w1, w2)
    out_odd = jax.block_until_ready(se_layer(x_odd, w1, w2))
    assert out_odd.shape == (B, C, 15, 15)
    assert jnp.allclose(out_odd, ref_odd, atol=2e-5, rtol=1e-5), "fused odd-HW mismatch"

    # Split (hoisted-excitation + tiled-scale) path, even and ragged tiling.
    out_split = jax.block_until_ready(
        se_layer(x, w1, w2, force_split=True, tile_hw=128))
    assert jnp.allclose(out_split, ref, atol=2e-5, rtol=1e-5), "split mismatch"
    out_split_odd = jax.block_until_ready(
        se_layer(x_odd, w1, w2, force_split=True, tile_hw=128))
    assert jnp.allclose(out_split_odd, ref_odd, atol=2e-5, rtol=1e-5), \
        "split odd-HW mismatch"

    print("KERNEL_OK")
</pallas_src>

<mosaic_0001>
module attributes {stable_mosaic.version = 11 : i64} {
  func.func @_se_fused_kernel(%arg0: i32, %arg1: memref<1x4x256xf32, #tpu.memory_space<vmem>>, %arg2: memref<4x4xf32, #tpu.memory_space<vmem>>, %arg3: memref<4x4xf32, #tpu.memory_space<vmem>>, %arg4: memref<1x4x256xf32, #tpu.memory_space<vmem>>) attributes {dimension_semantics = [#tpu.dimension_semantics<parallel>], iteration_bounds = array<i64: 2>, scalar_prefetch = 0 : i64, scratch_operands = 0 : i64, tpu.core_type = #tpu.core_type<tc>, window_params = [{transform_indices = @transform_0, window_bounds = array<i64: 1, 4, 256>}, {pipeline_mode = #tpu.pipeline_mode<synchronous>, transform_indices = @transform_1, window_bounds = array<i64: 4, 4>}, {pipeline_mode = #tpu.pipeline_mode<synchronous>, transform_indices = @transform_2, window_bounds = array<i64: 4, 4>}, {transform_indices = @transform_3, window_bounds = array<i64: 1, 4, 256>}]} {
    %c0 = arith.constant 0 : index
    %c0_0 = arith.constant 0 : index
    %c0_1 = arith.constant 0 : index
    %0 = vector.load %arg1[%c0, %c0_0, %c0_1] : memref<1x4x256xf32, #tpu.memory_space<vmem>>, vector<1x4x256xf32>
    %1 = vector.shape_cast %0 : vector<1x4x256xf32> to vector<4x256xf32>
    %cst = arith.constant 1.000000e+00 : f32
    %2 = vector.broadcast %cst : f32 to vector<256x1xf32>
    %cst_2 = arith.constant dense<0.000000e+00> : vector<4x1xf32>
    %3 = tpu.matmul %1, %2, %cst_2 {dimension_numbers = #tpu.dot_dimension_numbers<[1], [0], [0], [1], [0, 0, 1, 1], [], []>} : vector<4x256xf32>, vector<256x1xf32>, vector<4x1xf32> -> vector<4x1xf32>
    %cst_3 = arith.constant 3.906250e-03 : f32
    %4 = vector.broadcast %cst_3 : f32 to vector<4x1xf32>
    %5 = arith.mulf %3, %4 : vector<4x1xf32>
    %c0_4 = arith.constant 0 : index
    %c0_5 = arith.constant 0 : index
    %6 = vector.load %arg2[%c0_4, %c0_5] : memref<4x4xf32, #tpu.memory_space<vmem>>, vector<4x4xf32>
    %cst_6 = arith.constant dense<0.000000e+00> : vector<4x1xf32>
    %7 = tpu.matmul %6, %5, %cst_6 {dimension_numbers = #tpu.dot_dimension_numbers<[1], [0], [0], [1], [0, 0, 1, 1], [], []>} : vector<4x4xf32>, vector<4x1xf32>, vector<4x1xf32> -> vector<4x1xf32>
    %cst_7 = arith.constant 0.000000e+00 : f32
    %8 = vector.broadcast %cst_7 : f32 to vector<4x1xf32>
    %9 = arith.maximumf %7, %8 : vector<4x1xf32>
    %c0_8 = arith.constant 0 : index
    %c0_9 = arith.constant 0 : index
    %10 = vector.load %arg3[%c0_8, %c0_9] : memref<4x4xf32, #tpu.memory_space<vmem>>, vector<4x4xf32>
    %cst_10 = arith.constant dense<0.000000e+00> : vector<4x1xf32>
    %11 = tpu.matmul %10, %9, %cst_10 {dimension_numbers = #tpu.dot_dimension_numbers<[1], [0], [0], [1], [0, 0, 1, 1], [], []>} : vector<4x4xf32>, vector<4x1xf32>, vector<4x1xf32> -> vector<4x1xf32>
    %12 = arith.negf %11 : vector<4x1xf32>
    %13 = math.exp %12 : vector<4x1xf32>
    %cst_11 = arith.constant 1.000000e+00 : f32
    %14 = vector.broadcast %cst_11 : f32 to vector<4x1xf32>
    %15 = arith.addf %14, %13 : vector<4x1xf32>
    %16 = arith.divf %14, %15 : vector<4x1xf32>
    %17 = vector.broadcast %16 : vector<4x1xf32> to vector<4x256xf32>
    %18 = arith.mulf %1, %17 : vector<4x256xf32>
    %c0_12 = arith.constant 0 : index
    %c0_13 = arith.constant 0 : index
    %c0_14 = arith.constant 0 : index
    %19 = vector.load %arg4[%c0_12, %c0_13, %c0_14] : memref<1x4x256xf32, #tpu.memory_space<vmem>>, vector<1x4x256xf32>
    %20 = vector.shape_cast %19 : vector<1x4x256xf32> to vector<4x256xf32>
    %21 = vector.shape_cast %18 : vector<4x256xf32> to vector<1x4x256xf32>
    tpu.vector_store %arg4[%c0_12, %c0_13, %c0_14], %21 {strides = array<i32>} : memref<1x4x256xf32, #tpu.memory_space<vmem>>, vector<1x4x256xf32>,
    return
  }
  func.func @transform_0(%arg0: i32) -> (i32, i32, i32) {
    %c0_i32 = arith.constant 0 : i32
    %c0_i32_0 = arith.constant 0 : i32
    %c0_i32_1 = arith.constant 0 : i32
    return %arg0, %c0_i32, %c0_i32_0 : i32, i32, i32
  }
  func.func @transform_1(%arg0: i32) -> (i32, i32) {
    %c0_i32 = arith.constant 0 : i32
    %c0_i32_0 = arith.constant 0 : i32
    %c0_i32_1 = arith.constant 0 : i32
    return %c0_i32, %c0_i32_0 : i32, i32
  }
  func.func @transform_2(%arg0: i32) -> (i32, i32) {
    %c0_i32 = arith.constant 0 : i32
    %c0_i32_0 = arith.constant 0 : i32
    %c0_i32_1 = arith.constant 0 : i32
    return %c0_i32, %c0_i32_0 : i32, i32
  }
  func.func @transform_3(%arg0: i32) -> (i32, i32, i32) {
    %c0_i32 = arith.constant 0 : i32
    %c0_i32_0 = arith.constant 0 : i32
    %c0_i32_1 = arith.constant 0 : i32
    return %arg0, %c0_i32, %c0_i32_0 : i32, i32, i32
  }
}

</mosaic_0001>

<bundles_post_ra>
// kernel: tpu_custom_call.1
= control target key start
LH: loop header
LB: loop body
LE: loop exit
PB: predicated region body
PF: predicated region fallthrough
CT: control target
= control target key end

     0   :  { %8 = vsyncpa [#allocation3], 0  ;;  %s1069_s0 = inlined_call_operand.hbm [shape: f32[2,4,256], index: 0, kind: input, shape index: {}]   ;;  %s1070_s1 = inlined_call_operand.hbm [shape: f32[4,4], index: 1, kind: input, shape index: {}]   ;;  %s1071_s2 = inlined_call_operand.vmem [shape: f32[4,4], index: 2, kind: input, shape index: {}]   ;;  %s1072_s3 = inlined_call_operand.hbm [shape: f32[2,4,256], index: 3, kind: output, shape index: {}]  }
   0x1   :  { %10 = vsyncpa [#allocation3 + $0x1], 0 }
   0x2   :  { %11 = vsyncpa [#allocation6], 0 }
   0x3   :  { %12 = vsyncpa [#allocation4], 0 }
   0x4   :  { %14 = vsyncpa [#allocation4 + $0x1], 0  ;;  %s861_s12 = smov 0   ;;  %s863_s13 = smov 0  }
   0x5   :  { %s865_s14 = smov 0   ;;  %s867_s15 = smov 0  }
   0x6 LB: > { %s882_s16 = sadd.s32 4294967295, %s831_s15   ;;  %s547_s17 = sadd.s32 4294967294, %s831_s15   ;;  %s831_s15 = sphi %s867_s15, %s1096_s15   ;;  %s827_s14 = sphi %s865_s14, %s1095_s14   ;;  %s823_s13 = sphi %s863_s13, %s1094_s13   ;;  %s819_s12 = sphi %s861_s12, %s1093_s12  }
   0x7   : > { %p40_p0 = scmp.ne.s32.totalorder %s823_s13, %s819_s12  ;;  %p1073_p1 = scmp.eq.s32.totalorder %s882_s16, 0 }
   0x8   : > { %p112_p3 = scmp.eq.s32.totalorder %s547_s17, 1  ;;  %p548_p5 = scmp.ge.s32.totalorder %s831_s15, 1 }
   0x9   : > { %p891_p4 = por %p1073_p1, %p40_p0  ;;  %p119_p7 = scmp.lt.s32.totalorder %s831_s15, 3 }
   0xa   : > { %p896_p6 = por %p112_p3, %p40_p0  ;;  %s833_s21 = smov [#allocation5]  }
   0xb   : > { %s1076_s18 = scalar_select %p891_p4, 1, 0 }
   0xc   : > { %s1077_s19 = scalar_select %p896_p6, 1, 0 }
   0xd   : > { %p901_p8 = pnand %p548_p5, %p119_p7  ;;  %s132_s22 = sshll.u32 %s833_s21, 4  ;;  %s133_s22 = int_to_ptr.vmem [resolvable:$true] %s132_s22 }
   0xe   : > { %s909_s23 = sadd.s32 1, %s831_s15   ;;  %s27_s27 = sadd.s32 1, %s827_s14 }
   0xf   : > { %s1078_s20 = scalar_select %p901_p8, 1, 0 }
  0x10   : > { %p643_p10 = pneg %p901_p8  ;;  %s24_s25 = ssub.s32 %s831_s15, %s909_s23 }
  0x11   : > { %p919_p12 = scmp.eq.s32.totalorder %s24_s25, 0  ;;  %s703_s30 = scalar_lea.hbm %s1070_s1, 64 }
  0x12   : > { %p913_p11 = pnand %p643_p10, %p1073_p1  ;;  %p704_p0 = scmp.ne.s32.totalorder %s1070_s1, %s703_s30 }
  0x13   : > { %s1080_s26 = scalar_select %p919_p12, 1, 0 }
  0x14   : > { %p705_p3 = pneg %p913_p11  ;;  %p710_p10 = scmp.lt.u32.totalorder %s703_s30, %s1070_s1 }
  0x16   : > { %p706_p5 = pnand %p705_p3, %p704_p0 }
  0x18   : > { %p707_p7 = pneg %p706_p5 }
  0x1a   : > { %p712_p9 = pnand %p710_p10, %p707_p7 }
  0x1c   : > { %715 = shalt.err (!%p712_p9)
}
  0x1d   : > { %s716_s8 = scalar_lea.vmem %s133_s22, 64  ;;  %p724_p6 = scmp.lt.s32.totalorder %s133_s22, %s133_s22 }
  0x1e   : > { %p717_p1 = scmp.ne.s32.totalorder %s133_s22, %s716_s8  ;;  %p725_p4 = scmp.lt.s32.totalorder %s716_s8, %s716_s8 }
  0x20   : > { %p719_p2 = pnand %p717_p1, %p705_p3  ;;  %p726_p8 = por %p725_p4, %p724_p6 }
  0x22   : > { %p720_p13 = pneg %p719_p2 }
  0x24   : > { %p727_p12 = pnand %p726_p8, %p720_p13 }
  0x26   : > { %730 = shalt.err (!%p727_p12)
}
  0x27   : > { %646 = dma.hbm_to_vmem [thread:$0]  (!%p913_p11), %s1070_s1, 64, %s133_s22, [#allocation6]  }
  0x28   : > { %p1081_p1 = scmp.ne.s32.totalorder %s1080_s26, 0  ;;  %p35_p2 = scmp.eq.s32.totalorder %s831_s15, 0 }
  0x29   : > { %p1082_p4 = scmp.ne.s32.totalorder %s827_s14, %s823_s13  ;;  %p1083_p6 = scmp.eq.s32.totalorder %s882_s16, 1 }
  0x2a   : > { %s945_s11 = scalar_select %p1081_p1, %s827_s14, %s27_s27  }
  0x2b   : > { %p953_p8 = por %p1083_p6, %p1082_p4  ;;  %p656_p9 = scmp.lt.s32.totalorder %s831_s15, 2 }
  0x2c   : > { %s146_s21 = sand.u32 1, %s827_s14   ;;  %p1085_p12 = pmov %p1082_p4 }
  0x2d   : > { %s551_s24 = sshll.u32 %s146_s21, 3  ;;  %s568_s25 = sshll.u32 %s831_s15, 7 }
  0x2e   : > { %p36_p13 = por %p35_p2, %p1085_p12  ;;  %s966_s22 = scalar_lea.hbm %s1069_s0, %s568_s25 }
  0x2f   : > { %s150_s26 = scalar_lea.vmem [#allocation2], %s551_s24  ;;  %s147_s4 = scalar_lea.sflag [#allocation3], %s146_s21 }
  0x30   : > { %s158_s27 = sshll.u32 %s150_s26, 4  ;;  %p968_p11 = pnand %p656_p9, %p36_p13  ;;  %s972_s27 = int_to_ptr.vmem [resolvable:$true] %s158_s27 }
  0x31   : > { %s731_s5 = scalar_lea.hbm %s966_s22, 128  ;;  %s736_s8 = scalar_lea.hbm %s1069_s0, 256 }
  0x32   : > { %p732_p0 = scmp.ne.s32.totalorder %s966_s22, %s731_s5  ;;  %p733_p3 = pneg %p968_p11 }
  0x33   : > { %p737_p10 = scmp.lt.u32.totalorder %s966_s22, %s1069_s0  ;;  %p738_p1 = scmp.lt.u32.totalorder %s736_s8, %s731_s5 }
  0x34   : > { %p734_p5 = pnand %p733_p3, %p732_p0  ;;  %p740_p4 = scmp.lt.u32.totalorder %s731_s5, %s966_s22 }
  0x35   : > { %p739_p2 = por %p738_p1, %p737_p10 }
  0x36   : > { %p735_p7 = pneg %p734_p5 }
  0x37   : > { %p741_p6 = por %p740_p4, %p739_p2 }
  0x39   : > { %p742_p9 = pnand %p741_p6, %p735_p7 }
  0x3b   : > { %745 = shalt.err (!%p742_p9)
}
  0x3c   : > { %s746_s21 = scalar_lea.vmem %s972_s27, 128  ;;  %s834_s24 = smov [#allocation2]  }
  0x3d   : > { %p747_p12 = scmp.ne.s32.totalorder %s972_s27, %s746_s21  ;;  %s751_s25 = sshll.u32 %s834_s24, 4  ;;  %s752_s25 = int_to_ptr.vmem [resolvable:$false] %s751_s25 }
  0x3e   : > { %s753_s28 = scalar_lea.vmem %s752_s25, 256  ;;  %p754_p5 = scmp.lt.s32.totalorder %s972_s27, %s752_s25 }
  0x3f   : > { %p749_p13 = pnand %p747_p12, %p733_p3  ;;  %p755_p10 = scmp.lt.s32.totalorder %s753_s28, %s746_s21 }
  0x41   : > { %p750_p0 = pneg %p749_p13  ;;  %p756_p1 = por %p755_p10, %p754_p5 }
  0x43   : > { %p757_p2 = pnand %p756_p1, %p750_p0 }
  0x45   : > { %760 = shalt.err (!%p757_p2)
}
  0x46   : > { %650 = dma.hbm_to_vmem [thread:$0]  (!%p968_p11), %s966_s22, 128, %s972_s27, %s147_s4  }
  0x47   : > { %p1087_p7 = scmp.ne.s32.totalorder %s1078_s20, 0 }
  0x48   : > { %s1002_s29 = sand.u32 (!%p1087_p7), 1, %s823_s13   ;;  %p1088_p3 = scmp.ne.s32.totalorder (!%p1087_p7), %s1076_s18, 0 }
  0x49   : > { %167 = sbr.rel (%p1087_p7) target bundleno = 934 (0x3a6), region = 32  ;;  %s555_s26 = sshll.u32 (!%p1087_p7), %s1002_s29, 3 }
  0x4a   : > { %s170_s5 = scalar_lea.sflag (!%p1087_p7), [#allocation3], %s1002_s29  ;;  %s173_s6 = scalar_lea.vmem (!%p1087_p7), [#allocation2], %s555_s26 }
  0x50   : > { %806 = dma.done.wait (%p1088_p3), %s170_s5, 128  }
  0x51   : > { %808 = vsyncadd (%p1088_p3), %s170_s5, 4294967168  ;;  %p1089_p11 = scmp.eq.s32.totalorder %s882_s16, 0 }
  0x53   : > { %810 = dma.done.wait (%p1089_p11), [#allocation6], 64   ;;  %p1090_p4 = pmov %p1089_p11 }
  0x54   : > { %v835_v0 = vmov 1.0|1.0   ;;  %v200_v1 = vld [vmem:[%s173_s6] sm:$0xff]  ;;  %v836_v3 = vmov 0.0   ;;  %vm837_vm0 = vmmov 0   ;;  %vm280_vm1 = vcmask 1043456  }
  0x55   : > { %812 = vsyncadd (%p1090_p4), [#allocation6], 4294967232  ;;  %619 = vmatprep.subr.bf16.mxu0 %v835_v0  ;;  %v202_v2 = vcombine.high %v200_v1, %v200_v1  ;;  %609 = vmatprep.subr.mxu1 %v836_v3  ;;  %v275_v8 = vld [vmem:[#allocation5] sm:$0xf]  ;;  %vm276_vm2 = vcmask 31744   ;;  %v838_v13 = vmov 0   ;;  %v445_v22 = vlaneseq }
  0x56   : > { %620 = vmatpush3.bf16.msra.mxu0 %v835_v0  ;;  %611 = vmatprep.mubr.msk.f32.mxu1 %vm837_vm0, %v836_v3  ;;  %v355_v12 = vld [vmem:[%s1071_s2] sm:$0xf]  ;;  %v839_v20 = vmov 839922192   ;;  %s569_s22 = sshll.u32 %s882_s16, 7  ;;  %s199_s27 = scalar_lea.vmem [#allocation7], %s555_s26 }
  0x57   : > { %621 = vmatprep.subr.bf16.mxu0 %v835_v0  ;;  %268 = vmatprep.mubr.f32.mxu0 %v202_v2  ;;  %v443_v21 = vunpack.c.l.s4 %v839_v20  ;;  %v446_v24 = vshrl.u32 %v445_v22, 7  ;;  %s467_s30 = sshll.u32 %s199_s27, 4  ;;  %s1025_s8 = scalar_lea.hbm %s1072_s3, %s569_s22  ;;  %s1027_s30 = int_to_ptr.vmem [resolvable:$true] %s467_s30 }
  0x58   : > { %697 = vset.pattern.permute.xlu0 %v838_v13  ;;  %s453_s9 = scalar_lea.sflag [#allocation4], %s1002_s29  ;;  %s761_s10 = scalar_lea.vmem %s1027_s30, 128 }
  0x59   : > { %v444_v23 = vunpack.c.0.s8 %v443_v21  ;;  %p762_p6 = scmp.ne.s32.totalorder %s1027_s30, %s761_s10  ;;  %s840_s16 = smov [#allocation7]  }
  0x5a   : > { %622 = vmatpush3.bf16.msra.mxu0 %v835_v0  ;;  %s765_s21 = sshll.u32 %s840_s16, 4  ;;  %s766_s21 = int_to_ptr.vmem [resolvable:$false] %s765_s21 }
  0x5b   : > { %623 = vmatprep.subr.bf16.mxu0 %v835_v0  ;;  %v447_v25 = vsub.s32 %v444_v23, %v446_v24  ;;  %p763_p9 = pnand %p762_p6, %p953_p8  ;;  %s767_s24 = scalar_lea.vmem %s766_s21, 256 }
  0x5c   : > { %p768_p13 = scmp.lt.s32.totalorder %s1027_s30, %s766_s21  ;;  %p769_p0 = scmp.lt.s32.totalorder %s767_s24, %s761_s10 }
  0x5d   : > { %p764_p12 = pneg %p763_p9 }
  0x5e   : > { %624 = vmatpush3.bf16.msra.mxu0 %v835_v0  ;;  %p770_p5 = por %p769_p0, %p768_p13 }
  0x5f   : > { %625 = vmatprep.subr.bf16.mxu0 %v835_v0 }
  0x60   : > { %p771_p10 = pnand %p770_p5, %p764_p12 }
  0x62   : > { %626 = vmatpush3.bf16.msra.mxu0 %v835_v0 }
  0x63   : > { %627 = vmatprep.subr.bf16.mxu0 %v835_v0 }
  0x66   : > { %628 = vmatpush3.bf16.msra.mxu0 %v835_v0 }
  0x67   : > { %629 = vmatprep.subr.bf16.mxu0 %v835_v0 }
  0x6a   : > { %630 = vmatpush3.bf16.msra.mxu0 %v835_v0 }
  0x6b   : > { %631 = vmatprep.subr.bf16.mxu0 %v835_v0 }
  0x6e   : > { %632 = vmatpush3.bf16.msra.mxu0 %v835_v0 }
  0x6f   : > { %633 = vmatprep.subr.bf16.mxu0 %v835_v0 }
  0x72   : > { %634 = vmatpush3.bf16.msra.mxu0 %v835_v0 }
  0x75   : > { %269 = vmatmul.mubr.f32.vlgmr.msra.gmra.mrb[0].mxu0 %v200_v1 }
 0x148   : > { %v602_v4 = vpop.f32.mrb[0].mxu0 }
 0x149   : > { %v603_v5 = vpop.f32.mrb[1].mxu0 }
 0x14a   : > { %v604_v6 = vadd.f32 %v603_v5, %v602_v4 }
 0x14c   : > { %v274_v7 = vmul.f32 0.00390625, %v604_v6 }
 0x14e   : > { %610 = vmatpush3.msk.msra.mxu1 %vm280_vm1, %v274_v7 }
 0x14f   : > { %612 = vmatmul.mubr.msk.f32.vlgmr.msra.gmra.mrb[0].mxu1 %vm276_vm2, %v275_v8  ;;  %614 = vmatprep.subr.mxu1 %v836_v3 }
 0x150   : > { %616 = vmatprep.mubr.msk.f32.mxu1 %vm837_vm0, %v836_v3 }
 0x222   : > { %v350_v9 = vpop.f32.mrb[0].mxu1 }
 0x223   : > { %v354_v10 = vmax.f32 %v350_v9, 0.0  ;;  %v613_v11 = vpop.f32.mrb[1].mxu1 }
 0x225   : > { %615 = vmatpush3.msk.msra.mxu1 %vm280_vm1, %v354_v10 }
 0x226   : > { %617 = vmatmul.mubr.msk.f32.vlgmr.msra.gmra.mrb[2].mxu1 %vm276_vm2, %v355_v12 }
 0x2f9   : > { %v428_v14 = vpop.f32.mrb[2].mxu1 }
 0x2fa   : > { %v562_v15 = vmul.f32 -1.442695, %v428_v14  ;;  %v618_v16 = vpop.f32.mrb[3].mxu1 }
 0x2fc   : > { %699 = vpow2.f32 %v562_v15 }
 0x306   : > { %v700_v17 = vpop.eup %699 }
 0x307   : > { %v435_v18 = vadd.f32 1.0, %v700_v17 }
 0x309   : > { %701 = vrcp.f32 %v435_v18 }
 0x313   : > { %v702_v19 = vpop.eup %701 }
 0x314   : > { %440 = vperm.xlu0 %697, %v702_v19  }
 0x393   : > { %v441_v26 = vpop.permute.xlu0 %440 }
 0x394   : > { %v448_v27 = vrot.slane %v441_v26, %v447_v25 }
 0x396   : > { %v450_v28 = vmul.f32 %v448_v27, %v200_v1 }
 0x398   : > { %451 = vst [vmem:[%s199_s27] sm:$0xff] %v450_v28 }
 0x399   : > { %774 = shalt.err (!%p771_p10)
}
 0x39a   : > { %s775_s25 = scalar_lea.hbm %s1025_s8, 128  ;;  %s779_s26 = scalar_lea.hbm %s1072_s3, 256 }
 0x39b   : > { %p776_p1 = scmp.ne.s32.totalorder %s1025_s8, %s775_s25  ;;  %p780_p3 = scmp.lt.u32.totalorder %s1025_s8, %s1072_s3 }
 0x39c   : > { %p781_p11 = scmp.lt.u32.totalorder %s779_s26, %s775_s25  ;;  %p783_p6 = scmp.lt.u32.totalorder %s775_s25, %s1025_s8 }
 0x39d   : > { %p777_p2 = pnand %p776_p1, %p953_p8 }
 0x39e   : > { %p782_p4 = por %p781_p11, %p780_p3 }
 0x39f   : > { %p778_p7 = pneg %p777_p2 }
 0x3a0   : > { %p784_p9 = por %p783_p6, %p782_p4 }
 0x3a2   : > { %p785_p12 = pnand %p784_p9, %p778_p7 }
 0x3a4   : > { %788 = shalt.err (!%p785_p12)
}
 0x3a5   : > { %641 = dma.vmem_to_hbm [thread:$0]  (%p953_p8), %s1027_s30, 128, %s1025_s8, %s453_s9  }
 0x3a6 PF: > { %s479_s18 = sand.u32 1, %s819_s12   ;;  %p1091_p13 = scmp.ne.s32.totalorder %s1077_s19, 0 }
 0x3a7   : > { %p1092_p0 = scmp.ge.s32.totalorder %s831_s15, 2  ;;  %s480_s20 = scalar_lea.sflag [#allocation4], %s479_s18 }
 0x3a9   : > { %p652_p5 = pnand %p1092_p0, %p1091_p13 }
 0x3ab   : > { %814 = dma.done.wait (!%p652_p5), %s480_s20, 128  }
 0x3ac   : > { %816 = vsyncadd (!%p652_p5), %s480_s20, 4294967168  ;;  %p17_p10 = scmp.ge.s32.totalorder %s909_s23, 4   ;;  %s1093_s12 = smov %s823_s13 }
 0x3ad   : > { %s1094_s13 = smov %s827_s14  ;;  %s1095_s14 = smov %s945_s11 }
 0x3ae   : > { %s1096_s15 = smov %s909_s23  ;;  %19 = sbr.rel (!%p17_p10) target bundleno = 6 (0x6), region = 81 }
 0x3b5   :  { %485 = vsyncpa [#allocation3], 1 }
 0x3b6   :  { %487 = vsyncpa [#allocation3 + $0x1], 1 }
 0x3b7   :  { %488 = vsyncpa [#allocation6], 1 }
 0x3b8   :  { %489 = vsyncpa [#allocation4], 1 }
 0x3b9   :  { %491 = vsyncpa [#allocation4 + $0x1], 1 }

</bundles_post_ra>
